<compile_context>
chip_gen: v6e
topology: v6e:2x2x1
jax: 0.10.0
libtpu: 0.0.40
codegen_flags: <defaults>
</compile_context>

<pallas_src>
import jax
import jax.numpy as jnp
from jax.experimental import pallas as pl
from jax.experimental.pallas import tpu as pltpu


# ----------------------------------------------------------------------------
# Pooling-matrix construction (host side).
# ----------------------------------------------------------------------------
def _pool_out_size(size, k, s, p, ceil_mode):
    if ceil_mode:
        out = -(-(size + 2 * p - k) // s) + 1
        # torch: last window must start inside the (left-)padded input
        if (out - 1) * s >= size + p:
            out -= 1
    else:
        out = (size + 2 * p - k) // s + 1
    return out


def _pool_matrix(size, k, s, p, ceil_mode, count_include_pad):
    """(size, out) matrix M with M[i, o] = pooling weight of input i in window o."""
    out = _pool_out_size(size, k, s, p, ceil_mode)
    i = jnp.arange(size)[:, None]          # unpadded input index
    o = jnp.arange(out)[None, :]
    start = o * s - p                      # window start in unpadded coords
    in_win = (i >= start) & (i < start + k)
    if count_include_pad:
        w = jnp.where(in_win, 1.0 / k, 0.0)
    else:
        valid = jnp.maximum(jnp.sum(in_win, axis=0, keepdims=True), 1)
        w = jnp.where(in_win, 1.0 / valid, 0.0)
    # TODO(synk): ceil_mode=True together with count_include_pad=True uses a clamped
    # divisor in PyTorch for windows that spill past the padded input; not reproduced.
    return w.astype(jnp.float32)           # (size, out)


# ----------------------------------------------------------------------------
# Small helpers.
# ----------------------------------------------------------------------------
def _rup(a, m):
    return -(-a // m) * m


def _vmem_limit(nbytes):
    # >= the default scoped limit on every generation, <= v7x's 64 MiB physical.
    return int(min(max(2 * nbytes, 32 << 20), 48 << 20))


def _pick_c_chunk(c, hw_elems, itemsize, target_bytes):
    """Largest TPU-friendly channel chunk (multiple of 8 dividing C, or C itself)."""
    c_chunk = min(c, max(1, target_bytes // max(1, hw_elems * itemsize)))
    if c_chunk < c:
        c_chunk = max(8, (c_chunk // 8) * 8)
        while c_chunk > 8 and c % c_chunk != 0:
            c_chunk -= 8
        if c % c_chunk != 0:
            # TODO(synk): channel counts with no multiple-of-8 divisor fall back to whole-C blocks.
            c_chunk = c
    return c_chunk


# ----------------------------------------------------------------------------
# Path A: lane-dense (C, H*W) blocks + single combined-kron matmul.
# ----------------------------------------------------------------------------
def _pool_kron(x, ph, pw, ho, wo):
    n, c, h, w = x.shape
    hw, howo = h * w, ho * wo
    itemsize = jnp.dtype(x.dtype).itemsize

    # Combined pooling matrix with the 1/C channel-mean factor folded in:
    # K[h*W+w, o*Wo+q] = Ph[o,h] * Pw[w,q] / C
    kmat = (jnp.einsum('oh,wq->hwoq', ph, pw).reshape(hw, howo) / c).astype(jnp.float32)

    target = 2 << 20                     # ~2 MiB input block (double-buffered -> ~4 MiB)
    img_bytes = c * hw * itemsize
    if img_bytes <= target:
        # Small images: batch B images per grid step, whole C at once.
        b = max(1, min(n, target // max(1, img_bytes)))
        while n % b != 0:
            b -= 1
        c_chunk = c
    else:
        # Large images: one image per step, tile the channel axis.
        b = 1
        c_chunk = _pick_c_chunk(c, hw, itemsize, target)
    ncc = c // c_chunk

    x4 = x.reshape(n // b, b, c, hw)     # contiguous NCHW -> free reshape

    def kernel(x_ref, k_ref, o_ref, acc_ref):
        ci = pl.program_id(1)

        @pl.when(ci == 0)
        def _():
            acc_ref[...] = jnp.zeros_like(acc_ref)

        # channel partial-sum on the lane-dense (B, Cc, H*W) slab
        acc_ref[...] += jnp.sum(x_ref[0].astype(jnp.float32), axis=1)     # (B, H*W)

        @pl.when(ci == ncc - 1)
        def _():
            # single lane-dense matmul: (B, H*W) @ (H*W, Ho*Wo)
            o_ref[0] = jnp.dot(acc_ref[...], k_ref[...],
                               preferred_element_type=jnp.float32).astype(o_ref.dtype)

    blk_in = b * _rup(c_chunk, 8) * _rup(hw, 128) * itemsize
    blk_k = _rup(hw, 8) * _rup(howo, 128) * 4
    blk_out = b * _rup(howo, 128) * itemsize
    acc_b = _rup(b, 8) * _rup(hw, 128) * 4
    vmem = _vmem_limit(2 * (blk_in + blk_k + blk_out) + acc_b)

    out = pl.pallas_call(
        kernel,
        out_shape=jax.ShapeDtypeStruct((n // b, b, howo), x.dtype),
        grid_spec=pltpu.PrefetchScalarGridSpec(
            num_scalar_prefetch=0,
            grid=(n // b, ncc),
            in_specs=[
                pl.BlockSpec((1, b, c_chunk, hw), lambda i, j: (i, 0, j, 0)),
                pl.BlockSpec((hw, howo), lambda i, j: (0, 0)),
            ],
            out_specs=pl.BlockSpec((1, b, howo), lambda i, j: (i, 0, 0)),
            scratch_shapes=[pltpu.VMEM((b, hw), jnp.float32)],
        ),
        compiler_params=pltpu.CompilerParams(
            dimension_semantics=("parallel", "arbitrary"),
            vmem_limit_bytes=vmem,
        ),
    )(x4, kmat)

    return out.reshape(n, 1, ho, wo)     # lane-dense store, reshape outside the kernel


# ----------------------------------------------------------------------------
# Path B: separable two-matmul fallback for huge spatial maps (kron would blow up).
# Channel-chunked accumulation; 1/C folded into Ph; lanes are ~full since W is large here.
# ----------------------------------------------------------------------------
def _pool_separable(x, ph, pw, ho, wo):
    n, c, h, w = x.shape
    itemsize = jnp.dtype(x.dtype).itemsize
    ph = (ph / c).astype(jnp.float32)    # fold channel-mean factor

    target = 4 << 20
    c_chunk = _pick_c_chunk(c, h * w, itemsize, target)
    ncc = c // c_chunk

    def kernel(x_ref, ph_ref, pw_ref, o_ref, acc_ref):
        ci = pl.program_id(1)

        @pl.when(ci == 0)
        def _():
            acc_ref[...] = jnp.zeros_like(acc_ref)

        acc_ref[...] += jnp.sum(x_ref[0].astype(jnp.float32), axis=0)     # (H, W)

        @pl.when(ci == ncc - 1)
        def _():
            y = jnp.dot(acc_ref[...], pw_ref[...],
                        preferred_element_type=jnp.float32)              # (H, Wo)
            o_ref[0, 0] = jnp.dot(ph_ref[...], y,
                                  preferred_element_type=jnp.float32).astype(o_ref.dtype)

    blk_in = c_chunk * _rup(h, 8) * _rup(w, 128) * itemsize
    blk_ph = _rup(ho, 8) * _rup(h, 128) * 4
    blk_pw = _rup(w, 8) * _rup(wo, 128) * 4
    blk_out = _rup(ho, 8) * _rup(wo, 128) * itemsize
    acc_b = _rup(h, 8) * _rup(w, 128) * 4
    vmem = _vmem_limit(2 * (blk_in + blk_ph + blk_pw + blk_out) + acc_b)

    return pl.pallas_call(
        kernel,
        out_shape=jax.ShapeDtypeStruct((n, 1, ho, wo), x.dtype),
        grid_spec=pltpu.PrefetchScalarGridSpec(
            num_scalar_prefetch=0,
            grid=(n, ncc),
            in_specs=[
                pl.BlockSpec((1, c_chunk, h, w), lambda i, j: (i, j, 0, 0)),
                pl.BlockSpec((ho, h), lambda i, j: (0, 0)),
                pl.BlockSpec((w, wo), lambda i, j: (0, 0)),
            ],
            out_specs=pl.BlockSpec((1, 1, ho, wo), lambda i, j: (i, 0, 0, 0)),
            scratch_shapes=[pltpu.VMEM((h, w), jnp.float32)],
        ),
        compiler_params=pltpu.CompilerParams(
            dimension_semantics=("parallel", "arbitrary"),
            vmem_limit_bytes=vmem,
        ),
    )(x, ph, pw)


# ----------------------------------------------------------------------------
# Public wrapper (matches PositionalAveragePooling.forward).
# ----------------------------------------------------------------------------
def positional_average_pooling(x, kernel_size=2, stride=None, padding=0,
                               ceil_mode=False, count_include_pad=True,
                               max_kron_bytes=8 << 20):
    stride = stride or kernel_size
    n, c, h, w = x.shape

    pw = _pool_matrix(w, kernel_size, stride, padding, ceil_mode, count_include_pad)    # (W, Wo)
    ph = _pool_matrix(h, kernel_size, stride, padding, ceil_mode, count_include_pad).T  # (Ho, H)
    ho, wo = ph.shape[0], pw.shape[1]

    if h * w * ho * wo * 4 <= max_kron_bytes:
        return _pool_kron(x, ph, pw, ho, wo)
    return _pool_separable(x, ph, pw, ho, wo)


# ----------------------------------------------------------------------------
# Reference + test.
# ----------------------------------------------------------------------------
def _reference(x, k, s, p):
    pooled = jax.lax.reduce_window(
        x, 0.0, jax.lax.add,
        window_dimensions=(1, 1, k, k),
        window_strides=(1, 1, s, s),
        padding=[(0, 0), (0, 0), (p, p), (p, p)],
    ) / float(k * k)
    return jnp.sum(pooled, axis=1, keepdims=True) / x.shape[1]


if __name__ == "__main__":
    key = jax.random.PRNGKey(0)
    x = jax.random.normal(key, (2, 4, 16, 16), dtype=jnp.float32)

    # Case 1: kernel_size=2, stride=2, padding=0 (kron / lane-dense path).
    out = jax.block_until_ready(
        positional_average_pooling(x, kernel_size=2, stride=2, padding=0))
    ref = _reference(x, 2, 2, 0)
    assert out.shape == (2, 1, 8, 8), out.shape
    assert jnp.allclose(out, ref, atol=1e-5, rtol=1e-5), "mismatch vs reference (k2s2)"

    # Case 2: kernel_size=3, stride=2, padding=1 (kron path with padding).
    out2 = jax.block_until_ready(
        positional_average_pooling(x, kernel_size=3, stride=2, padding=1))
    ref2 = _reference(x, 3, 2, 1)
    assert out2.shape == ref2.shape, (out2.shape, ref2.shape)
    assert jnp.allclose(out2, ref2, atol=1e-5, rtol=1e-5), "mismatch vs reference (k3s2p1)"

    # Case 3: force the separable large-spatial fallback path on the same input.
    out3 = jax.block_until_ready(
        positional_average_pooling(x, kernel_size=2, stride=2, padding=0,
                                   max_kron_bytes=0))
    assert jnp.allclose(out3, ref, atol=1e-5, rtol=1e-5), "mismatch vs reference (separable)"

    print("KERNEL_OK")
</pallas_src>

<mosaic_0001>
module attributes {stable_mosaic.version = 11 : i64} {
  func.func @kernel(%arg0: i32, %arg1: i32, %arg2: memref<1x2x4x256xf32, #tpu.memory_space<vmem>>, %arg3: memref<256x64xf32, #tpu.memory_space<vmem>>, %arg4: memref<1x2x64xf32, #tpu.memory_space<vmem>>, %arg5: memref<2x256xf32, #tpu.memory_space<vmem>>) attributes {dimension_semantics = [#tpu.dimension_semantics<parallel>, #tpu.dimension_semantics<arbitrary>], iteration_bounds = array<i64: 1, 1>, scalar_prefetch = 0 : i64, scratch_operands = 1 : i64, tpu.core_type = #tpu.core_type<tc>, window_params = [{transform_indices = @transform_0, window_bounds = array<i64: 1, 2, 4, 256>}, {pipeline_mode = #tpu.pipeline_mode<synchronous>, transform_indices = @transform_1, window_bounds = array<i64: 256, 64>}, {transform_indices = @transform_2, window_bounds = array<i64: 1, 2, 64>}]} {
    %c0_i32 = arith.constant 0 : i32
    %0 = arith.cmpi eq, %arg1, %c0_i32 : i32
    %1 = arith.extui %0 : i1 to i32
    %c0_i32_0 = arith.constant 0 : i32
    %2 = arith.cmpi ne, %1, %c0_i32_0 : i32
    scf.if %2 {
      %cst_10 = arith.constant 0.000000e+00 : f32
      %12 = vector.broadcast %cst_10 : f32 to vector<2x256xf32>
      %c0_11 = arith.constant 0 : index
      %c0_12 = arith.constant 0 : index
      %13 = vector.load %arg5[%c0_11, %c0_12] : memref<2x256xf32, #tpu.memory_space<vmem>>, vector<2x256xf32>
      tpu.vector_store %arg5[%c0_11, %c0_12], %12 {strides = array<i32>} : memref<2x256xf32, #tpu.memory_space<vmem>>, vector<2x256xf32>,
    } else {
    }
    %c0 = arith.constant 0 : index
    %c0_1 = arith.constant 0 : index
    %3 = vector.load %arg5[%c0, %c0_1] : memref<2x256xf32, #tpu.memory_space<vmem>>, vector<2x256xf32>
    %c0_2 = arith.constant 0 : index
    %c0_3 = arith.constant 0 : index
    %c0_4 = arith.constant 0 : index
    %c0_5 = arith.constant 0 : index
    %4 = vector.load %arg2[%c0_2, %c0_3, %c0_4, %c0_5] : memref<1x2x4x256xf32, #tpu.memory_space<vmem>>, vector<1x2x4x256xf32>
    %5 = vector.shape_cast %4 : vector<1x2x4x256xf32> to vector<2x4x256xf32>
    %cst = arith.constant dense<0.000000e+00> : vector<2x256xf32>
    %6 = vector.multi_reduction <add>, %5, %cst [1] : vector<2x4x256xf32> to vector<2x256xf32>
    %7 = arith.addf %3, %6 : vector<2x256xf32>
    %c0_6 = arith.constant 0 : index
    %c0_7 = arith.constant 0 : index
    %8 = vector.load %arg5[%c0_6, %c0_7] : memref<2x256xf32, #tpu.memory_space<vmem>>, vector<2x256xf32>
    tpu.vector_store %arg5[%c0_6, %c0_7], %7 {strides = array<i32>} : memref<2x256xf32, #tpu.memory_space<vmem>>, vector<2x256xf32>,
    %c0_i32_8 = arith.constant 0 : i32
    %9 = arith.cmpi eq, %arg1, %c0_i32_8 : i32
    %10 = arith.extui %9 : i1 to i32
    %c0_i32_9 = arith.constant 0 : i32
    %11 = arith.cmpi ne, %10, %c0_i32_9 : i32
    scf.if %11 {
      %c0_10 = arith.constant 0 : index
      %c0_11 = arith.constant 0 : index
      %12 = vector.load %arg5[%c0_10, %c0_11] : memref<2x256xf32, #tpu.memory_space<vmem>>, vector<2x256xf32>
      %c0_12 = arith.constant 0 : index
      %c0_13 = arith.constant 0 : index
      %13 = vector.load %arg3[%c0_12, %c0_13] : memref<256x64xf32, #tpu.memory_space<vmem>>, vector<256x64xf32>
      %cst_14 = arith.constant dense<0.000000e+00> : vector<2x64xf32>
      %14 = tpu.matmul %12, %13, %cst_14 {dimension_numbers = #tpu.dot_dimension_numbers<[1], [0], [0], [1], [0, 0, 1, 1], [], []>} : vector<2x256xf32>, vector<256x64xf32>, vector<2x64xf32> -> vector<2x64xf32>
      %c0_15 = arith.constant 0 : index
      %c0_16 = arith.constant 0 : index
      %c0_17 = arith.constant 0 : index
      %15 = vector.load %arg4[%c0_15, %c0_16, %c0_17] : memref<1x2x64xf32, #tpu.memory_space<vmem>>, vector<1x2x64xf32>
      %16 = vector.shape_cast %15 : vector<1x2x64xf32> to vector<2x64xf32>
      %17 = vector.shape_cast %14 : vector<2x64xf32> to vector<1x2x64xf32>
      tpu.vector_store %arg4[%c0_15, %c0_16, %c0_17], %17 {strides = array<i32>} : memref<1x2x64xf32, #tpu.memory_space<vmem>>, vector<1x2x64xf32>,
    } else {
    }
    return
  }
  func.func @transform_0(%arg0: i32, %arg1: i32) -> (i32, i32, i32, i32) {
    %c0_i32 = arith.constant 0 : i32
    %c0_i32_0 = arith.constant 0 : i32
    %c0_i32_1 = arith.constant 0 : i32
    return %arg0, %c0_i32, %arg1, %c0_i32_0 : i32, i32, i32, i32
  }
  func.func @transform_1(%arg0: i32, %arg1: i32) -> (i32, i32) {
    %c0_i32 = arith.constant 0 : i32
    %c0_i32_0 = arith.constant 0 : i32
    %c0_i32_1 = arith.constant 0 : i32
    return %c0_i32, %c0_i32_0 : i32, i32
  }
  func.func @transform_2(%arg0: i32, %arg1: i32) -> (i32, i32, i32) {
    %c0_i32 = arith.constant 0 : i32
    %c0_i32_0 = arith.constant 0 : i32
    %c0_i32_1 = arith.constant 0 : i32
    return %arg0, %c0_i32, %c0_i32_0 : i32, i32, i32
  }
}

</mosaic_0001>

<bundles_post_ra>
// kernel: tpu_custom_call.1
= control target key start
LH: loop header
LB: loop body
LE: loop exit
PB: predicated region body
PF: predicated region fallthrough
CT: control target
= control target key end

     0   :  { %v287_v4 = vmov 0.0   ;;  %vm26_vm0 = vcmask 1043456   ;;  %s414_s0 = inlined_call_operand.vmem [shape: f32[1,2,4,256], index: 0, kind: input, shape index: {}]   ;;  %s415_s1 = inlined_call_operand.vmem [shape: f32[256,64], index: 1, kind: input, shape index: {}]   ;;  %s416_s2 = inlined_call_operand.hbm [shape: f32[1,2,64], index: 2, kind: output, shape index: {}]  }
   0x1   :  { %v126_v0 = vld [vmem:[%s415_s1 + $0xf8] sm:$0xff]  ;;  %v125_v2 = vld [vmem:[%s415_s1 + $0xf0] sm:$0xff]  ;;  %16 = vst [vmem:[#allocation2] sm:$0xf] %v287_v4  ;;  %v124_v5 = vld [vmem:[%s415_s1 + $0xe8] sm:$0xff] }
   0x2   :  { %v110_v1 = vld [vmem:[%s415_s1 + $0x78] sm:$0xff]  ;;  %225 = vmatprep.subr.mxu0 %v126_v0  ;;  %v109_v3 = vld [vmem:[%s415_s1 + $0x70] sm:$0xff]  ;;  %v108_v6 = vld [vmem:[%s415_s1 + $0x68] sm:$0xff] }
   0x3   :  { %226 = vmatpush3.msra.mxu0 %v110_v1  ;;  %v123_v7 = vld [vmem:[%s415_s1 + $0xe0] sm:$0xff]  ;;  %v122_v9 = vld [vmem:[%s415_s1 + $0xd8] sm:$0xff]  ;;  %v121_v11 = vld [vmem:[%s415_s1 + $0xd0] sm:$0xff] }
   0x4   :  { %227 = vmatprep.subr.mxu0 %v125_v2  ;;  %v107_v8 = vld [vmem:[%s415_s1 + $0x60] sm:$0xff]  ;;  %v106_v10 = vld [vmem:[%s415_s1 + $0x58] sm:$0xff]  ;;  %v105_v12 = vld [vmem:[%s415_s1 + $0x50] sm:$0xff] }
   0x5   :  { %228 = vmatpush3.msra.mxu0 %v109_v3  ;;  %v120_v13 = vld [vmem:[%s415_s1 + $0xc8] sm:$0xff]  ;;  %v18_v15 = vld [vmem:[%s414_s0] sm:$0xff] }
   0x6   :  { %229 = vmatprep.subr.mxu0 %v124_v5  ;;  %v104_v14 = vld [vmem:[%s415_s1 + $0x48] sm:$0xff] }
   0x7   :  { %230 = vmatpush3.msra.mxu0 %v108_v6  ;;  %v19_v16 = vld [vmem:[%s414_s0 + $0x8] sm:$0xff] }
   0x8   :  { %231 = vmatprep.subr.mxu0 %v123_v7 }
   0x9   :  { %232 = vmatpush3.msra.mxu0 %v107_v8 }
   0xa   :  { %233 = vmatprep.subr.mxu0 %v122_v9 }
   0xb   :  { %234 = vmatpush3.msra.mxu0 %v106_v10 }
   0xc   :  { %235 = vmatprep.subr.mxu0 %v121_v11 }
   0xd   :  { %7 = vsyncpa [#allocation4], 0  ;;  %236 = vmatpush3.msra.mxu0 %v105_v12  ;;  %v119_v17 = vld [vmem:[%s415_s1 + $0xc0] sm:$0xff]  ;;  %v22_v18 = vcombine.high %v18_v15, %v18_v15  ;;  %v23_v19 = vcombine.high %v19_v16, %v19_v16  ;;  %v27_v20 = vsel %vm26_vm0, %v18_v15, 0.0  ;;  %v41_v21 = vsel %vm26_vm0, %v19_v16, 0.0  ;;  %v118_v25 = vld [vmem:[%s415_s1 + $0xb8] sm:$0xff] }
   0xe   :  { %237 = vmatprep.subr.mxu0 %v120_v13  ;;  %v103_v22 = vld [vmem:[%s415_s1 + $0x40] sm:$0xff]  ;;  %v28_v23 = vrot.slane %v27_v20, 4  ;;  %v42_v24 = vrot.slane %v41_v21, 4  ;;  %v102_v28 = vld [vmem:[%s415_s1 + $0x38] sm:$0xff]  ;;  %v117_v33 = vld [vmem:[%s415_s1 + $0xb0] sm:$0xff]  ;;  %v63_v36 = vlaneseq  ;;  %vm80_vm1 = vcmask 1041409  }
   0xf   :  { %238 = vmatpush3.msra.mxu0 %v104_v14  ;;  %v34_v26 = vsel %vm26_vm0, %v22_v18, 0.0  ;;  %v48_v27 = vsel %vm26_vm0, %v23_v19, 0.0  ;;  %v288_v34 = vmov 1983009808   ;;  %v101_v37 = vld [vmem:[%s415_s1 + $0x30] sm:$0xff]  ;;  %v116_v42 = vld [vmem:[%s415_s1 + $0xa8] sm:$0xff] }
  0x10   :  { %239 = vmatprep.subr.mxu0 %v119_v17  ;;  %v29_v29 = vadd.f32 %v28_v23, %v27_v20  ;;  %v35_v30 = vrot.slane %v34_v26, 4  ;;  %v43_v31 = vadd.f32 %v42_v24, %v41_v21  ;;  %v49_v32 = vrot.slane %v48_v27, 4  ;;  %v100_v43 = vld [vmem:[%s415_s1 + $0x28] sm:$0xff]  ;;  %v115_v48 = vld [vmem:[%s415_s1 + $0xa0] sm:$0xff]  ;;  %v114_v56 = vld [vmem:[%s415_s1 + $0x98] sm:$0xff] }
  0x11   :  { %240 = vmatpush3.msra.mxu0 %v103_v22  ;;  %v61_v35 = vunpack.c.l.s4 %v288_v34  ;;  %v64_v50 = vshrl.u32 %v63_v36, 7  ;;  %v99_v51 = vld [vmem:[%s415_s1 + $0x20] sm:$0xff]  ;;  %v98_v57 = vld [vmem:[%s415_s1 + $0x18] sm:$0xff]  ;;  %v113_v62 = vld [vmem:[%s415_s1 + $0x90] sm:$0xff]  ;;  %vm82_vm2 = vcmask 1043459   ;;  %vm84_vm3 = vcmask 1045509  }
  0x12   :  { %241 = vmatprep.subr.mxu0 %v118_v25  ;;  %v30_v38 = vrot.slane %v29_v29, 2  ;;  %v36_v39 = vadd.f32 %v35_v30, %v34_v26  ;;  %v44_v40 = vrot.slane %v43_v31, 2  ;;  %v50_v41 = vadd.f32 %v49_v32, %v48_v27  ;;  %v97_v63 = vld [vmem:[%s415_s1 + $0x10] sm:$0xff]  ;;  %v112_v3 = vld [vmem:[%s415_s1 + $0x88] sm:$0xff]  ;;  %v111_v7 = vld [vmem:[%s415_s1 + $0x80] sm:$0xff] }
  0x13   :  { %242 = vmatpush3.msra.mxu0 %v102_v28  ;;  %v62_v49 = vunpack.c.0.s8 %v61_v35  ;;  %v96_v4 = vld [vmem:[%s415_s1 + $0x8] sm:$0xff]  ;;  %v95_v8 = vld [vmem:[%s415_s1] sm:$0xff]  ;;  %vm86_vm4 = vcmask 1047559   ;;  %s289_s1 = smov [#allocation3]   ;;  %vm208_vm5 = vcmask 517120  }
  0x14   :  { %243 = vmatprep.subr.mxu0 %v117_v33  ;;  %v31_v44 = vadd.f32 %v30_v38, %v29_v29  ;;  %v37_v45 = vrot.slane %v36_v39, 2  ;;  %v45_v46 = vadd.f32 %v44_v40, %v43_v31  ;;  %v51_v47 = vrot.slane %v50_v41, 2  ;;  %v17_v13 = vld [vmem:[#allocation2] sm:$0xf]  ;;  %s216_s19 = sshll.u32 %s289_s1, 4  ;;  %s217_s19 = int_to_ptr.vmem [resolvable:$true] %s216_s19 }
  0x15   :  { %244 = vmatpush3.msra.mxu0 %v101_v37  ;;  %v65_v2 = vsub.s32 %v62_v49, %v64_v50  ;;  %s265_s20 = scalar_lea.vmem %s217_s19, 32  ;;  %p270_p1 = scmp.lt.s32.totalorder %s217_s19, %s217_s19 }
  0x16   :  { %245 = vmatprep.subr.mxu0 %v116_v42  ;;  %v32_v52 = vrot.slane %v31_v44, 1  ;;  %v38_v53 = vadd.f32 %v37_v45, %v36_v39  ;;  %v46_v54 = vrot.slane %v45_v46, 1  ;;  %v52_v55 = vadd.f32 %v51_v47, %v50_v41  ;;  %p266_p0 = scmp.ne.s32.totalorder %s217_s19, %s265_s20  ;;  %p271_p2 = scmp.lt.s32.totalorder %s265_s20, %s265_s20 }
  0x17   :  { %246 = vmatpush3.msra.mxu0 %v100_v43 }
  0x18   :  { %247 = vmatprep.subr.mxu0 %v115_v48  ;;  %v33_v58 = vadd.f32 %v32_v52, %v31_v44  ;;  %v39_v59 = vrot.slane %v38_v53, 1  ;;  %v47_v60 = vadd.f32 %v46_v54, %v45_v46  ;;  %v53_v61 = vrot.slane %v52_v55, 1  ;;  %p272_p3 = por %p271_p2, %p270_p1 }
  0x19   :  { %248 = vmatpush3.msra.mxu0 %v99_v51 }
  0x1a   :  { %249 = vmatprep.subr.mxu0 %v114_v56  ;;  %v40_v0 = vadd.f32 %v39_v59, %v38_v53  ;;  %v54_v1 = vadd.f32 %v53_v61, %v52_v55  ;;  %p273_p4 = pnand %p272_p3, %p266_p0 }
  0x1b   :  { %250 = vmatpush3.msra.mxu0 %v98_v57 }
  0x1c   :  { %251 = vmatprep.subr.mxu0 %v113_v62  ;;  %v59_v5 = vcombine.low %v33_v58, %v40_v0  ;;  %v67_v6 = vcombine.low %v47_v60, %v54_v1 }
  0x1d   :  { %252 = vmatpush3.msra.mxu0 %v97_v63 }
  0x1e   :  { %253 = vmatprep.subr.mxu0 %v112_v3  ;;  %v66_v9 = vrot.slane %v59_v5, %v65_v2  ;;  %v74_v10 = vrot.slane %v67_v6, %v65_v2 }
  0x1f   :  { %254 = vmatpush3.msra.mxu0 %v96_v4 }
  0x20   :  { %255 = vmatprep.subr.mxu0 %v111_v7  ;;  %v79_v11 = vrot.slane %v74_v10, 7 }
  0x21   :  { %256 = vmatpush3.msra.mxu0 %v95_v8 }
  0x22   :  { %v81_v12 = vsel %vm80_vm1, %v79_v11, %v66_v9 }
  0x23   :  { %v83_v14 = vsel %vm82_vm2, %v79_v11, %v81_v12 }
  0x24   :  { %v85_v15 = vsel %vm84_vm3, %v79_v11, %v83_v14 }
  0x25   :  { %v87_v16 = vsel %vm86_vm4, %v79_v11, %v85_v15 }
  0x26   :  { %v89_v17 = vadd.f32 %v87_v16, %v17_v13 }
  0x28   :  { %90 = vst [vmem:[#allocation2] sm:$0xf] %v89_v17 }
  0x2f   :  { %v224_v18 = vld.sshfl [vmem:[#allocation2] sm:$0x33 pattern:$0x76325410] }
  0x30   :  { %v135_v19 = vcombine.high %v224_v18, %v224_v18 }
  0x32   :  { %202 = vmatprep.mubr.f32.mxu0 %v135_v19 }
  0x33   :  { %203 = vmatmul.mubr.f32.vlgmr.msra.gmra.mxu0 %v224_v18 }
  0xf3   :  { %v257_v20 = vpop.f32.mrf.mxu0 }
  0xf5   :  { %v258_v21 = vpop.f32.mrf.mxu0 }
  0xf6   :  { %v259_v22 = vadd.f32 %v258_v21, %v257_v20 }
  0xf8   :  { %209 = vst.msk [vmem:[#allocation3] sm:$0x3] %vm208_vm5, %v259_v22 }
  0xf9   :  { %276 = shalt.err (!%p273_p4)
}
  0xfa   :  { %219 = dma.vmem_to_hbm [thread:$0]  %s217_s19, 32, %s416_s2, [#allocation4]  }
  0xfb   :  { %285 = dma.done.wait [#allocation4], 32  }
  0xfc   :  { %286 = vsyncadd [#allocation4], 4294967264 }
  0xfd   :  { %223 = vsyncpa [#allocation4], 1 }

</bundles_post_ra>
